<compile_context>
chip_gen: v6e
topology: v6e:2x2x1
jax: 0.10.0
libtpu: 0.0.40
codegen_flags: <defaults>
</compile_context>

<pallas_src>
import functools

import jax
import jax.numpy as jnp
from jax.experimental import pallas as pl
from jax.experimental.pallas import tpu as pltpu


def _round_up(x, m):
    return ((x + m - 1) // m) * m


def _moe_linear_b_kernel(x_ref, w_ref, o_ref):
    # x_ref: (Eb, tb, r) bf16, w_ref: (Eb, r, tn) bf16, o_ref: (Eb, tb, tn).
    # Batched matmul over the expert axis; contraction over r; f32 accumulate.
    y = jax.lax.dot_general(
        x_ref[...],
        w_ref[...],
        dimension_numbers=(((2,), (1,)), ((0,), (0,))),
        preferred_element_type=jnp.float32,
    )
    o_ref[...] = y.astype(o_ref.dtype)


def _pick_tiles(E, B, r, out_pad, x_bytes, w_bytes, o_bytes, budget_bytes):
    """Choose (experts-per-step, token tile, out tile) under a VMEM budget."""
    # Lane-dense output tile: out_pad is always a multiple of 128, so 128
    # always divides it; prefer a larger divisor when available.
    tn = 128
    for cand in (512, 384, 256):
        if out_pad % cand == 0:
            tn = cand
            break
    # Token (sublane) tile; the caller pads B up to a multiple of tb, so any
    # 8-aligned choice is legal (avoids pathological tiny tiles).
    tb = min(512, _round_up(max(B, 1), 8))
    per_expert = tb * r * x_bytes + r * tn * w_bytes + tb * tn * o_bytes
    Eb = 1
    for cand in range(E, 0, -1):
        if E % cand == 0 and cand * per_expert <= budget_bytes:
            Eb = cand
            break
    # TODO(synk): if r is very large (non-LoRA use), add a K grid axis with an
    # f32 VMEM accumulator instead of keeping the full contraction in one block.
    return Eb, tb, tn


@functools.partial(jax.jit, static_argnames=("out_features",))
def moe_linear_b_stacked(x_stacked, w_t_padded, *, out_features):
    """x_stacked: (E, B, r); w_t_padded: (E, r, out_pad) bf16 -> (E, B, out)."""
    E, B, r = x_stacked.shape
    _, _, out_pad = w_t_padded.shape
    out_dtype = x_stacked.dtype

    Eb, tb, tn = _pick_tiles(
        E, B, r, out_pad,
        x_bytes=2, w_bytes=2, o_bytes=jnp.dtype(out_dtype).itemsize,
        budget_bytes=6 * 1024 * 1024,
    )

    # Pad the token axis to a whole number of token tiles; cast to bf16.
    B_pad = _round_up(max(B, 1), tb)
    x = x_stacked.astype(jnp.bfloat16)
    if B_pad != B:
        x = jnp.pad(x, ((0, 0), (0, B_pad - B), (0, 0)))

    # Token axis innermost: the weight block index is independent of it, so
    # Pallas keeps the weight tile resident across token tiles.
    grid = (E // Eb, out_pad // tn, B_pad // tb)

    y = pl.pallas_call(
        _moe_linear_b_kernel,
        out_shape=jax.ShapeDtypeStruct((E, B_pad, out_pad), out_dtype),
        grid_spec=pltpu.PrefetchScalarGridSpec(
            num_scalar_prefetch=0,
            grid=grid,
            in_specs=[
                pl.BlockSpec((Eb, tb, r), lambda e, n, b: (e, b, 0)),
                pl.BlockSpec((Eb, r, tn), lambda e, n, b: (e, 0, n)),
            ],
            out_specs=pl.BlockSpec((Eb, tb, tn), lambda e, n, b: (e, b, n)),
        ),
        compiler_params=pltpu.CompilerParams(
            dimension_semantics=("parallel", "parallel", "parallel"),
            vmem_limit_bytes=32 * 1024 * 1024,
        ),
    )(x, w_t_padded)

    if B_pad != B or out_pad != out_features:
        y = y[:, :B, :out_features]
    return y


class CLMoEMOELinearB:
    """JAX/Pallas port of the PyTorch CLMoEMOELinearB module."""

    def __init__(self, in_features, out_features, expert_num, key,
                 compute_dtype=jnp.bfloat16):
        assert in_features % expert_num == 0
        self.expert_num = expert_num
        self.in_features = in_features
        self.out_features = out_features
        self.r = in_features // expert_num

        # Master weights, nn.Linear layout (out, in) per expert: (E, out, r).
        keys = jax.random.split(key, expert_num)
        bound = 1.0 / (self.r ** 0.5)
        self.weights = jnp.stack(
            [
                jax.random.uniform(
                    keys[i], (out_features, self.r), dtype=jnp.float32,
                    minval=-bound, maxval=bound,
                )
                for i in range(expert_num)
            ],
            axis=0,
        )

        # One-time kernel-friendly copy: transpose to (E, r, out), pad the out
        # axis to a lane multiple, cast to bf16.  No in-kernel transpose.
        out_pad = _round_up(out_features, 128)
        w_t = jnp.swapaxes(self.weights, 1, 2)  # (E, r, out)
        if out_pad != out_features:
            w_t = jnp.pad(w_t, ((0, 0), (0, 0), (0, out_pad - out_features)))
        self.w_t = w_t.astype(compute_dtype)     # (E, r, out_pad)

    def forward_stacked(self, x_stacked):
        """Preferred entry point for callers that already hold (E, B, r)."""
        return moe_linear_b_stacked(x_stacked, self.w_t,
                                    out_features=self.out_features)

    def __call__(self, x_list):
        """x_list: list of E arrays, each [..., r]. Returns list of [..., out]."""
        assert len(x_list) == self.expert_num
        lead_shape = x_list[0].shape[:-1]
        # Flatten leading dims so the kernel sees a single token axis.
        x_stacked = jnp.stack(
            [x.reshape(-1, self.r) for x in x_list], axis=0)   # (E, B, r)
        y_stacked = self.forward_stacked(x_stacked)            # (E, B, out)
        return [
            y_stacked[i].reshape(*lead_shape, self.out_features)
            for i in range(self.expert_num)
        ]


if __name__ == "__main__":
    key = jax.random.PRNGKey(0)
    k_w, k_x = jax.random.split(key)

    in_features = 32
    out_features = 16
    expert_num = 4
    batch = 8
    r = in_features // expert_num  # 8

    module = CLMoEMOELinearB(in_features, out_features, expert_num, k_w)

    x_keys = jax.random.split(k_x, expert_num)
    x_list = [
        jax.random.normal(x_keys[i], (batch, r), dtype=jnp.float32)
        for i in range(expert_num)
    ]

    outputs = module(x_list)
    outputs = [jax.block_until_ready(o) for o in outputs]

    # Reference checks.
    w_bf = module.weights.astype(jnp.bfloat16)
    for i, o in enumerate(outputs):
        assert o.shape == (batch, out_features)
        # Same-precision reference (bf16 operands, f32 accumulation).
        ref_bf = jnp.dot(
            x_list[i].astype(jnp.bfloat16), w_bf[i].T,
            preferred_element_type=jnp.float32,
        ).astype(jnp.float32)
        assert jnp.allclose(o, ref_bf, atol=2e-3, rtol=2e-3)
        # Sanity vs. full-f32 reference (loose tolerance for bf16 rounding).
        ref_f32 = x_list[i] @ module.weights[i].T
        assert jnp.allclose(o, ref_f32, atol=5e-2, rtol=5e-2)

    print("KERNEL_OK")
</pallas_src>

<mosaic_0001>
module attributes {stable_mosaic.version = 11 : i64} {
  func.func @_moe_linear_b_kernel(%arg0: i32, %arg1: i32, %arg2: i32, %arg3: memref<4x8x8xbf16, #tpu.memory_space<vmem>>, %arg4: memref<4x8x128xbf16, #tpu.memory_space<vmem>>, %arg5: memref<4x8x128xf32, #tpu.memory_space<vmem>>) attributes {dimension_semantics = [#tpu.dimension_semantics<parallel>, #tpu.dimension_semantics<parallel>, #tpu.dimension_semantics<parallel>], iteration_bounds = array<i64: 1, 1, 1>, scalar_prefetch = 0 : i64, scratch_operands = 0 : i64, tpu.core_type = #tpu.core_type<tc>, window_params = [{transform_indices = @transform_0, window_bounds = array<i64: 4, 8, 8>}, {transform_indices = @transform_1, window_bounds = array<i64: 4, 8, 128>}, {transform_indices = @transform_2, window_bounds = array<i64: 4, 8, 128>}]} {
    %c0 = arith.constant 0 : index
    %c0_0 = arith.constant 0 : index
    %c0_1 = arith.constant 0 : index
    %0 = vector.load %arg3[%c0, %c0_0, %c0_1] : memref<4x8x8xbf16, #tpu.memory_space<vmem>>, vector<4x8x8xbf16>
    %c0_2 = arith.constant 0 : index
    %c0_3 = arith.constant 0 : index
    %c0_4 = arith.constant 0 : index
    %1 = vector.load %arg4[%c0_2, %c0_3, %c0_4] : memref<4x8x128xbf16, #tpu.memory_space<vmem>>, vector<4x8x128xbf16>
    %cst = arith.constant dense<0.000000e+00> : vector<4x8x128xf32>
    %2 = tpu.matmul %0, %1, %cst {dimension_numbers = #tpu.dot_dimension_numbers<[2], [1], [1], [2], [0, 0, 0, 1, 1, 2], [0], [0]>} : vector<4x8x8xbf16>, vector<4x8x128xbf16>, vector<4x8x128xf32> -> vector<4x8x128xf32>
    %c0_5 = arith.constant 0 : index
    %c0_6 = arith.constant 0 : index
    %c0_7 = arith.constant 0 : index
    %3 = vector.load %arg5[%c0_5, %c0_6, %c0_7] : memref<4x8x128xf32, #tpu.memory_space<vmem>>, vector<4x8x128xf32>
    tpu.vector_store %arg5[%c0_5, %c0_6, %c0_7], %2 {strides = array<i32>} : memref<4x8x128xf32, #tpu.memory_space<vmem>>, vector<4x8x128xf32>,
    return
  }
  func.func @transform_0(%arg0: i32, %arg1: i32, %arg2: i32) -> (i32, i32, i32) {
    %c0_i32 = arith.constant 0 : i32
    %c0_i32_0 = arith.constant 0 : i32
    return %arg0, %arg2, %c0_i32 : i32, i32, i32
  }
  func.func @transform_1(%arg0: i32, %arg1: i32, %arg2: i32) -> (i32, i32, i32) {
    %c0_i32 = arith.constant 0 : i32
    %c0_i32_0 = arith.constant 0 : i32
    return %arg0, %c0_i32, %arg1 : i32, i32, i32
  }
  func.func @transform_2(%arg0: i32, %arg1: i32, %arg2: i32) -> (i32, i32, i32) {
    %c0_i32 = arith.constant 0 : i32
    return %arg0, %arg2, %arg1 : i32, i32, i32
  }
}

</mosaic_0001>

<bundles_post_ra>
// kernel: moe_linear_b_stacked.1
= control target key start
LH: loop header
LB: loop body
LE: loop exit
PB: predicated region body
PF: predicated region fallthrough
CT: control target
= control target key end

     0   :  { %vm25_vm0 = vcmask 1043456   ;;  %v290_v2 = vmov 0.0   ;;  %vm21_vm1 = vcmask 64512   ;;  %vm291_vm2 = vmmov 0   ;;  %s345_s0 = inlined_call_operand.vmem [shape: bf16[4,8,8], index: 0, kind: input, shape index: {}]   ;;  %s346_s1 = inlined_call_operand.vmem [shape: bf16[4,8,128], index: 1, kind: input, shape index: {}]   ;;  %s347_s2 = inlined_call_operand.hbm [shape: f32[4,8,128], index: 2, kind: output, shape index: {}]  }
   0x1   :  { %v17_v0 = vld [vmem:[%s346_s1] sm:$0xf]  ;;  %v18_v1 = vld [vmem:[%s346_s1 + $0x4] sm:$0xf]  ;;  %239 = vmatprep.subr.bf16.mxu0 %v290_v2  ;;  %245 = vmatprep.subr.bf16.mxu1 %v290_v2  ;;  %v19_v7 = vld [vmem:[%s346_s1 + $0x8] sm:$0xf] }
   0x2   :  { %v27_v3 = vsel %vm25_vm0, %v17_v0, 0  ;;  %v73_v4 = vsel %vm25_vm0, %v18_v1, 0  ;;  %v13_v5 = vld [vmem:[%s345_s0] sm:$0xf]  ;;  %v14_v6 = vld [vmem:[%s345_s0 + $0x4] sm:$0xf]  ;;  %241 = vmatprep.mubr.msk.bf16.mxu0 %vm291_vm2, %v290_v2  ;;  %247 = vmatprep.mubr.msk.bf16.mxu1 %vm291_vm2, %v290_v2 }
   0x3   :  { %240 = vmatpush3.bf16.msra.mxu0 %v27_v3  ;;  %246 = vmatpush3.bf16.msra.mxu1 %v73_v4  ;;  %v20_v8 = vld [vmem:[%s346_s1 + $0xc] sm:$0xf]  ;;  %v119_v9 = vsel %vm25_vm0, %v19_v7, 0 }
   0x4   :  { %v165_v10 = vsel %vm25_vm0, %v20_v8, 0  ;;  %251 = vmatprep.subr.bf16.mxu0 %v290_v2  ;;  %257 = vmatprep.subr.bf16.mxu1 %v290_v2 }
   0x5   :  { %7 = vsyncpa [#allocation3], 0  ;;  %v15_v11 = vld [vmem:[%s345_s0 + $0x8] sm:$0xf]  ;;  %v16_v12 = vld [vmem:[%s345_s0 + $0xc] sm:$0xf] }
   0x6   :  { %242 = vmatmul.mubr.msk.bf16.vlgmr.msra.gmra.mxu0 %vm21_vm1, %v13_v5  ;;  %248 = vmatmul.mubr.msk.bf16.vlgmr.msra.gmra.mxu1 %vm21_vm1, %v14_v6  ;;  %s292_s24 = smov [#allocation2]  }
   0x7   :  { %252 = vmatpush3.bf16.msra.mxu0 %v119_v9  ;;  %258 = vmatpush3.bf16.msra.mxu1 %v165_v10  ;;  %s216_s25 = sshll.u32 %s292_s24, 4  ;;  %s217_s25 = int_to_ptr.vmem [resolvable:$true] %s216_s25 }
   0x8   :  { %253 = vmatprep.mubr.msk.bf16.mxu0 %vm291_vm2, %v290_v2  ;;  %259 = vmatprep.mubr.msk.bf16.mxu1 %vm291_vm2, %v290_v2  ;;  %s268_s0 = scalar_lea.vmem %s217_s25, 512  ;;  %p273_p1 = scmp.lt.s32.totalorder %s217_s25, %s217_s25 }
   0x9   :  { %p269_p0 = scmp.ne.s32.totalorder %s217_s25, %s268_s0  ;;  %p274_p2 = scmp.lt.s32.totalorder %s268_s0, %s268_s0 }
   0xb   :  { %p275_p3 = por %p274_p2, %p273_p1 }
   0xd   :  { %p276_p4 = pnand %p275_p3, %p269_p0 }
   0xe   :  { %254 = vmatmul.mubr.msk.bf16.vlgmr.msra.gmra.mxu0 %vm21_vm1, %v15_v11  ;;  %260 = vmatmul.mubr.msk.bf16.vlgmr.msra.gmra.mxu1 %vm21_vm1, %v16_v12 }
  0xc6   :  { %v63_v13 = vpop.f32.mrf.mxu0  ;;  %v109_v14 = vpop.f32.mrf.mxu1 }
  0xc7   :  { %207 = vst [vmem:[#allocation2] sm:$0xff] %v63_v13  ;;  %208 = vst [vmem:[#allocation2 + $0x8] sm:$0xff] %v109_v14 }
  0xc8   :  { %v243_v15 = vpop.f32.mrf.mxu0  ;;  %v249_v16 = vpop.f32.mrf.mxu1 }
  0xca   :  { %v66_v17 = vpop.f32.mrf.mxu0  ;;  %v112_v18 = vpop.f32.mrf.mxu1 }
  0xcc   :  { %v244_v19 = vpop.f32.mrf.mxu0  ;;  %v250_v20 = vpop.f32.mrf.mxu1 }
  0xce   :  { %v155_v21 = vpop.f32.mrf.mxu0  ;;  %v201_v22 = vpop.f32.mrf.mxu1 }
  0xcf   :  { %209 = vst [vmem:[#allocation2 + $0x10] sm:$0xff] %v155_v21  ;;  %210 = vst [vmem:[#allocation2 + $0x18] sm:$0xff] %v201_v22 }
  0xd0   :  { %v255_v23 = vpop.f32.mrf.mxu0  ;;  %v261_v24 = vpop.f32.mrf.mxu1 }
  0xd1   :  { %279 = shalt.err (!%p276_p4)
}
  0xd2   :  { %s293_s26 = smov 128   ;;  %s294_s27 = smov 8   ;;  %v158_v25 = vpop.f32.mrf.mxu0  ;;  %v204_v26 = vpop.f32.mrf.mxu1 }
  0xd3   :  { %222 = dma.vmem_to_hbm [thread:$0]  %s217_s25, 512, %s347_s2, [#allocation3], %s293_s26, %s293_s26, %s294_s27  }
  0xd4   :  { %v256_v27 = vpop.f32.mrf.mxu0  ;;  %v262_v28 = vpop.f32.mrf.mxu1 }
  0xd5   :  { %288 = dma.done.wait [#allocation3], 512  }
  0xd6   :  { %289 = vsyncadd [#allocation3], 4294966784 }
  0xd7   :  { %226 = vsyncpa [#allocation3], 1 }

</bundles_post_ra>
